<compile_context>
chip_gen: v5e
topology: v5e:2x2
jax: 0.10.0
libtpu: 0.0.40
codegen_flags: <defaults>
</compile_context>

<pallas_src>
import jax
import jax.numpy as jnp
from jax.experimental import pallas as pl
from jax.experimental.pallas import tpu as pltpu


def _onehot_kernel(idx_actn_ref, idx_lang_ref, actn_ref, lang_ref):
    """Build one-hot rows: out[r, c] = (c == idx[r]) for both outputs."""
    actn_cols = jax.lax.broadcasted_iota(jnp.int32, actn_ref.shape, 1)
    lang_cols = jax.lax.broadcasted_iota(jnp.int32, lang_ref.shape, 1)
    actn_ref[...] = (actn_cols == idx_actn_ref[...]).astype(jnp.float32)
    lang_ref[...] = (lang_cols == idx_lang_ref[...]).astype(jnp.float32)


def random_model_forward(x, actn_size, lang_size, key=None, seed=0):
    """RandomModel.forward / .step.

    Args:
        x: (B, S, C, H, W) for forward, or (B, C, H, W) for step.
           Only the leading shape is used; values are ignored (as in PyTorch).
        key: optional jax PRNG key; if None, derived from `seed`.
    Returns:
        actn: (N, actn_size) float32 one-hot rows
        (lang,): tuple with lang (N, lang_size) float32 one-hot rows
        where N = B*S (5-D input) or B (4-D input).
    """
    assert x.ndim in (4, 5), "expected (B, S, C, H, W) or (B, C, H, W)"
    n_rows = x.shape[0] * x.shape[1] if x.ndim == 5 else x.shape[0]

    if key is None:
        key = jax.random.PRNGKey(seed)
    k_actn, k_lang = jax.random.split(key)
    # Uniform random indices (torch.randint semantics: high is exclusive).
    idx_actn = jax.random.randint(k_actn, (n_rows, 1), 0, actn_size, dtype=jnp.int32)
    idx_lang = jax.random.randint(k_lang, (n_rows, 1), 0, lang_size, dtype=jnp.int32)

    # Row tile: full array for small N (block == full dims is always legal),
    # otherwise 1024-row tiles (multiple of 8) pipelined over a 1-D grid.
    tm = n_rows if n_rows <= 1024 else 1024
    grid = (pl.cdiv(n_rows, tm),)

    actn, lang = pl.pallas_call(
        _onehot_kernel,
        out_shape=(
            jax.ShapeDtypeStruct((n_rows, actn_size), jnp.float32),
            jax.ShapeDtypeStruct((n_rows, lang_size), jnp.float32),
        ),
        grid=grid,
        in_specs=[
            pl.BlockSpec((tm, 1), lambda i: (i, 0)),
            pl.BlockSpec((tm, 1), lambda i: (i, 0)),
        ],
        out_specs=(
            pl.BlockSpec((tm, actn_size), lambda i: (i, 0)),
            pl.BlockSpec((tm, lang_size), lambda i: (i, 0)),
        ),
        compiler_params=pltpu.CompilerParams(
            dimension_semantics=("parallel",)),
        cost_estimate=pl.CostEstimate(
            flops=2 * n_rows * (actn_size + lang_size),
            transcendentals=0,
            bytes_accessed=n_rows * 4 * (actn_size + lang_size + 2)),
    )(idx_actn, idx_lang)

    return actn, (lang,)


if __name__ == "__main__":
    # Deterministic small example consistent with the module's forward:
    # x: (B, S, C, H, W); values are ignored by the model, only shape matters.
    B, S, C, H, W = 2, 8, 4, 16, 16
    ACTN_SIZE = 6
    LANG_SIZE = 10

    key = jax.random.PRNGKey(0)
    kx, kr = jax.random.split(key)
    x = jax.random.normal(kx, (B, S, C, H, W), dtype=jnp.float32)

    actn, (lang,) = random_model_forward(x, ACTN_SIZE, LANG_SIZE, key=kr)
    jax.block_until_ready((actn, lang))

    N = B * S
    assert actn.shape == (N, ACTN_SIZE) and actn.dtype == jnp.float32
    assert lang.shape == (N, LANG_SIZE) and lang.dtype == jnp.float32
    # Each row must be exactly one-hot (values in {0,1}, row-sum == 1).
    assert bool(jnp.all((actn == 0.0) | (actn == 1.0)))
    assert bool(jnp.all((lang == 0.0) | (lang == 1.0)))
    assert bool(jnp.all(jnp.sum(actn, axis=-1) == 1.0))
    assert bool(jnp.all(jnp.sum(lang, axis=-1) == 1.0))

    # Also exercise the 4-D step() path.
    actn_s, (lang_s,) = random_model_forward(
        x[:, 0], ACTN_SIZE, LANG_SIZE, key=jax.random.fold_in(kr, 1))
    jax.block_until_ready((actn_s, lang_s))
    assert actn_s.shape == (B, ACTN_SIZE) and lang_s.shape == (B, LANG_SIZE)

    print("KERNEL_OK")
</pallas_src>

<mosaic_0001>
module attributes {stable_mosaic.version = 11 : i64} {
  func.func @_onehot_kernel(%arg0: i32, %arg1: memref<16x1xi32, #tpu.memory_space<vmem>>, %arg2: memref<16x1xi32, #tpu.memory_space<vmem>>, %arg3: memref<16x6xf32, #tpu.memory_space<vmem>>, %arg4: memref<16x10xf32, #tpu.memory_space<vmem>>) attributes {dimension_semantics = [#tpu.dimension_semantics<parallel>], iteration_bounds = array<i64: 1>, scalar_prefetch = 0 : i64, scratch_operands = 0 : i64, tpu.core_type = #tpu.core_type<tc>, window_params = [{transform_indices = @transform_0, window_bounds = array<i64: 16, 1>}, {transform_indices = @transform_1, window_bounds = array<i64: 16, 1>}, {transform_indices = @transform_2, window_bounds = array<i64: 16, 6>}, {transform_indices = @transform_3, window_bounds = array<i64: 16, 10>}]} {
    %0 = tpu.iota {dimensions = array<i32: 1>} : vector<16x6xi32>
    %1 = tpu.iota {dimensions = array<i32: 1>} : vector<16x10xi32>
    %c0 = arith.constant 0 : index
    %c0_0 = arith.constant 0 : index
    %2 = vector.load %arg1[%c0, %c0_0] : memref<16x1xi32, #tpu.memory_space<vmem>>, vector<16x1xi32>
    %3 = vector.broadcast %2 : vector<16x1xi32> to vector<16x6xi32>
    %4 = arith.cmpi eq, %0, %3 : vector<16x6xi32>
    %5 = arith.extui %4 : vector<16x6xi1> to vector<16x6xi32>
    %6 = arith.sitofp %5 : vector<16x6xi32> to vector<16x6xf32>
    %c0_1 = arith.constant 0 : index
    %c0_2 = arith.constant 0 : index
    %7 = vector.load %arg3[%c0_1, %c0_2] : memref<16x6xf32, #tpu.memory_space<vmem>>, vector<16x6xf32>
    tpu.vector_store %arg3[%c0_1, %c0_2], %6 {strides = array<i32>} : memref<16x6xf32, #tpu.memory_space<vmem>>, vector<16x6xf32>,
    %c0_3 = arith.constant 0 : index
    %c0_4 = arith.constant 0 : index
    %8 = vector.load %arg2[%c0_3, %c0_4] : memref<16x1xi32, #tpu.memory_space<vmem>>, vector<16x1xi32>
    %9 = vector.broadcast %8 : vector<16x1xi32> to vector<16x10xi32>
    %10 = arith.cmpi eq, %1, %9 : vector<16x10xi32>
    %11 = arith.extui %10 : vector<16x10xi1> to vector<16x10xi32>
    %12 = arith.sitofp %11 : vector<16x10xi32> to vector<16x10xf32>
    %c0_5 = arith.constant 0 : index
    %c0_6 = arith.constant 0 : index
    %13 = vector.load %arg4[%c0_5, %c0_6] : memref<16x10xf32, #tpu.memory_space<vmem>>, vector<16x10xf32>
    tpu.vector_store %arg4[%c0_5, %c0_6], %12 {strides = array<i32>} : memref<16x10xf32, #tpu.memory_space<vmem>>, vector<16x10xf32>,
    return
  }
  func.func @transform_0(%arg0: i32) -> (i32, i32) {
    %c0_i32 = arith.constant 0 : i32
    %c0_i32_0 = arith.constant 0 : i32
    return %arg0, %c0_i32 : i32, i32
  }
  func.func @transform_1(%arg0: i32) -> (i32, i32) {
    %c0_i32 = arith.constant 0 : i32
    %c0_i32_0 = arith.constant 0 : i32
    return %arg0, %c0_i32 : i32, i32
  }
  func.func @transform_2(%arg0: i32) -> (i32, i32) {
    %c0_i32 = arith.constant 0 : i32
    %c0_i32_0 = arith.constant 0 : i32
    return %arg0, %c0_i32 : i32, i32
  }
  func.func @transform_3(%arg0: i32) -> (i32, i32) {
    %c0_i32 = arith.constant 0 : i32
    %c0_i32_0 = arith.constant 0 : i32
    return %arg0, %c0_i32 : i32, i32
  }
}

</mosaic_0001>

<bundles_post_ra>
// kernel: tpu_custom_call.1
= control target key start
LH: loop header
LB: loop body
LE: loop exit
PB: predicated region body
PF: predicated region fallthrough
CT: control target
= control target key end

     0   :  { %v109_v2 = vmov 0   ;;  %s159_s0 = inlined_call_operand.vmem [shape: s32[16,1], index: 0, kind: input, shape index: {}]   ;;  %s160_s1 = inlined_call_operand.vmem [shape: s32[16,1], index: 1, kind: input, shape index: {}]   ;;  %s161_s2 = inlined_call_operand.vmem [shape: f32[16,6], index: 2, kind: output, shape index: {0}]   ;;  %s162_s3 = inlined_call_operand.hbm [shape: f32[16,10], index: 3, kind: output, shape index: {1}]  }
   0x1   :  { %v33_v0 = vld [vmem:[%s160_s1] sm:$0xff]  ;;  %82 = vset.pattern.permute.xlu1 %v109_v2  ;;  %81 = vset.pattern.permute.xlu0 %v109_v2 }
   0x2   :  { %v16_v1 = vld [vmem:[%s159_s0] sm:$0xff] }
   0x3   :  { %9 = vsyncpa [#allocation3], 0  ;;  %36 = vperm.xlu0 %81, %v33_v0   ;;  %19 = vperm.xlu1 %82, %v16_v1   ;;  %v34_v3 = vld [vmem:[%s160_s1 + $0x8] sm:$0xff]  ;;  %v14_v5 = vlaneseq  ;;  %vm47_vm0 = vcmask 80896   ;;  %vm30_vm2 = vcmask 48128   ;;  %v110_v9 = vmov 0.0  }
   0x4   :  { %v17_v4 = vld [vmem:[%s159_s0 + $0x8] sm:$0xff]  ;;  %s111_s0 = smov [#allocation2]   ;;  %s58_s24 = sshll.u32 %s162_s3, 4  ;;  %s59_s24 = int_to_ptr.hbm [resolvable:$true] %s58_s24 }
   0x5   :  { %v15_v6 = vand.u32 127, %v14_v5  ;;  %s56_s21 = sshll.u32 %s111_s0, 4  ;;  %s112_s27 = smov 128   ;;  %s57_s21 = int_to_ptr.vmem [resolvable:$true] %s56_s21 }
   0x6   :  { %s113_s28 = smov 8  }
   0xb   :  { %39 = vperm.xlu0 %81, %v34_v3   ;;  %22 = vperm.xlu1 %82, %v17_v4  }
  0x75   :  { %v37_v7 = vpop.permute.xlu0 %36  ;;  %v20_v8 = vpop.permute.xlu1 %19 }
  0x76   :  { %vm41_vm1 = vcmp.eq.s32.totalorder %v15_v6, %v37_v7  ;;  %vm24_vm3 = vcmp.eq.s32.totalorder %v15_v6, %v20_v8 }
  0x77   :  { %v74_v10 = vsel %vm41_vm1, 1.0, %v110_v9  ;;  %v72_v11 = vsel %vm24_vm3, 1.0, %v110_v9 }
  0x78   :  { %48 = vst.msk [vmem:[#allocation2] sm:$0xff] %vm47_vm0, %v74_v10 }
  0x79   :  { %31 = vst.msk [vmem:[%s161_s2] sm:$0xff] %vm30_vm2, %v72_v11 }
  0x7d   :  { %v40_v12 = vpop.permute.xlu0 %39  ;;  %v23_v13 = vpop.permute.xlu1 %22 }
  0x7e   :  { %vm42_vm4 = vcmp.eq.s32.totalorder %v15_v6, %v40_v12  ;;  %vm25_vm5 = vcmp.eq.s32.totalorder %v15_v6, %v23_v13 }
  0x7f   :  { %v75_v14 = vsel %vm42_vm4, 1.0, %v110_v9  ;;  %v73_v15 = vsel %vm25_vm5, 1.0, %v110_v9 }
  0x80   :  { %49 = vst.msk [vmem:[#allocation2 + $0x8] sm:$0xff] %vm47_vm0, %v75_v14 }
  0x81   :  { %32 = vst.msk [vmem:[%s161_s2 + $0x8] sm:$0xff] %vm30_vm2, %v73_v15 }
  0x82   :  { %64 = dma.vmem_to_hbm [thread:$0]  %s57_s21, 256, %s59_s24, [#allocation3], %s112_s27, %s112_s27, %s113_s28  }
  0x83   :  { %107 = dma.done.wait [#allocation3], 256  }
  0x84   :  { %108 = vsyncadd [#allocation3], 4294967040 }
  0x85   :  { %71 = vsyncpa [#allocation3], 1 }

</bundles_post_ra>
